<compile_context>
chip_gen: v7x
topology: tpu7x:2x2x1
jax: 0.10.0
libtpu: 0.0.40
codegen_flags: <defaults>
</compile_context>

<pallas_src>
import functools

import jax
import jax.numpy as jnp
from jax.experimental import pallas as pl
from jax.experimental.pallas import tpu as pltpu


def _round_up(x, m):
    return (x + m - 1) // m * m


def _pick_seq_tile(n, target, multiple=16):
    """Largest tile <= target dividing n, preferring bf16-clean 16-row multiples."""
    if n <= target:
        return n
    for step in (multiple, 8):
        t = (min(target, n) // step) * step
        while t >= step:
            if n % t == 0:
                return t
            t -= step
    # TODO(synk): awkward N falls back to a full-length tile; may exceed VMEM.
    return n


# ----------------------------------------------------------------------------
# Kernel 1: fused input projections.
#   One matmul: x @ [Wq*scale | Wk | Wv]   (all head-major, per-head lanes
#   zero-padded to 128).  x is cast to the compute dtype inside the kernel.
# ----------------------------------------------------------------------------
def _proj_kernel(x_ref, w_ref, q_ref, k_ref, v_ref, *, hd):
    x = x_ref[0].astype(w_ref.dtype)                       # (tn, Dq), cast fused
    y = jnp.dot(x, w_ref[...], preferred_element_type=jnp.float32)  # (tn, 3*hd)
    # Static slices at 128-lane-aligned boundaries (hd is a multiple of 128).
    q_ref[0] = y[:, :hd].astype(q_ref.dtype)
    k_ref[0] = y[:, hd:2 * hd].astype(k_ref.dtype)
    v_ref[0] = y[:, 2 * hd:].astype(v_ref.dtype)


def _project(x, w_cat, *, hd, compute_dtype, seq_tile, vmem_limit):
    B, N, Dq = x.shape
    tn = _pick_seq_tile(N, seq_tile)
    out_spec = pl.BlockSpec((1, tn, hd), lambda b, t: (b, t, 0))
    return pl.pallas_call(
        functools.partial(_proj_kernel, hd=hd),
        out_shape=tuple(jax.ShapeDtypeStruct((B, N, hd), compute_dtype)
                        for _ in range(3)),
        grid=(B, N // tn),
        in_specs=[pl.BlockSpec((1, tn, Dq), lambda b, t: (b, t, 0)),
                  # Concatenated weight stays VMEM-resident (constant index map).
                  pl.BlockSpec((Dq, 3 * hd), lambda b, t: (0, 0))],
        out_specs=(out_spec, out_spec, out_spec),
        compiler_params=pltpu.CompilerParams(
            dimension_semantics=("parallel", "parallel"),
            vmem_limit_bytes=vmem_limit),
    )(x, w_cat)


# ----------------------------------------------------------------------------
# Kernel 2: flash-style attention with fused output projection.
#   Grid: (B, q_tiles, heads, kv_tiles).  Output block (1, tq, Dq_pad) is
#   constant across the trailing (head, kv) axes and accumulated in scratch.
# ----------------------------------------------------------------------------
def _attn_kernel(q_ref, k_ref, v_ref, wo_ref, bo_ref, o_ref,
                 m_sc, l_sc, acc_sc, oacc_sc):
    h = pl.program_id(2)
    ki = pl.program_id(3)
    nh = pl.num_programs(2)
    nk = pl.num_programs(3)

    @pl.when((h == 0) & (ki == 0))
    def _init_out():
        oacc_sc[...] = jnp.zeros(oacc_sc.shape, oacc_sc.dtype)

    @pl.when(ki == 0)
    def _init_head():
        m_sc[...] = jnp.full(m_sc.shape, -jnp.inf, m_sc.dtype)
        l_sc[...] = jnp.zeros(l_sc.shape, l_sc.dtype)
        acc_sc[...] = jnp.zeros(acc_sc.shape, acc_sc.dtype)

    q = q_ref[0]                       # (tq, dh_pad); softmax scale folded in Wq
    k = k_ref[0]                       # (tkv, dh_pad)
    v = v_ref[0]                       # (tkv, dh_pad)

    s = jax.lax.dot_general(           # (tq, tkv) scores, f32 MXU accumulation
        q, k, dimension_numbers=(((1,), (1,)), ((), ())),
        preferred_element_type=jnp.float32)

    m_prev = m_sc[...]
    m_new = jnp.maximum(m_prev, jnp.max(s, axis=-1, keepdims=True))
    alpha = jnp.exp(m_prev - m_new)
    p = jnp.exp(s - m_new)
    l_sc[...] = alpha * l_sc[...] + jnp.sum(p, axis=-1, keepdims=True)
    acc_sc[...] = alpha * acc_sc[...] + jnp.dot(
        p.astype(v.dtype), v, preferred_element_type=jnp.float32)
    m_sc[...] = m_new

    @pl.when(ki == nk - 1)
    def _head_out():
        # Normalize (EUP approx reciprocal) and accumulate this head's
        # contribution to the fused output projection.
        ctx = (acc_sc[...] * pl.reciprocal(l_sc[...], approx=True)
               ).astype(wo_ref.dtype)
        oacc_sc[...] += jnp.dot(ctx, wo_ref[...],
                                preferred_element_type=jnp.float32)

    @pl.when((h == nh - 1) & (ki == nk - 1))
    def _finalize():
        o_ref[0] = (oacc_sc[...] + bo_ref[...]).astype(o_ref.dtype)


def _attention(q, k, v, wo_p, bo_p, *, heads, dh_pad, dq_pad, out_dtype,
               q_tile, kv_tile, vmem_limit):
    B, N, _ = q.shape
    tq = _pick_seq_tile(N, q_tile)
    tkv = _pick_seq_tile(N, kv_tile)
    q_spec = pl.BlockSpec((1, tq, dh_pad), lambda b, qi, h, ki: (b, qi, h))
    kv_spec = pl.BlockSpec((1, tkv, dh_pad), lambda b, qi, h, ki: (b, ki, h))
    return pl.pallas_call(
        _attn_kernel,
        out_shape=jax.ShapeDtypeStruct((B, N, dq_pad), out_dtype),
        grid=(B, N // tq, heads, N // tkv),
        in_specs=[
            q_spec,
            kv_spec,
            kv_spec,
            # Per-head slice of the (padded) output-projection weight.
            pl.BlockSpec((dh_pad, dq_pad), lambda b, qi, h, ki: (h, 0)),
            # Bias stays resident (constant index map).
            pl.BlockSpec((1, dq_pad), lambda b, qi, h, ki: (0, 0)),
        ],
        out_specs=pl.BlockSpec((1, tq, dq_pad), lambda b, qi, h, ki: (b, qi, 0)),
        scratch_shapes=[
            pltpu.VMEM((tq, 1), jnp.float32),        # running max
            pltpu.VMEM((tq, 1), jnp.float32),        # running sum
            pltpu.VMEM((tq, dh_pad), jnp.float32),   # per-head PV accumulator
            pltpu.VMEM((tq, dq_pad), jnp.float32),   # fused-output accumulator
        ],
        compiler_params=pltpu.CompilerParams(
            dimension_semantics=("parallel", "parallel", "arbitrary", "arbitrary"),
            vmem_limit_bytes=vmem_limit),
    )(q, k, v, wo_p, bo_p)


# ----------------------------------------------------------------------------
# Full forward (mirrors Attention.forward for 3-D x, context=None, mask=None,
# dropout=0.0 which is an identity on the attention probabilities).
# ----------------------------------------------------------------------------
def attention_forward(x, params, *, heads, compute_dtype=jnp.bfloat16,
                      seq_tile=512, q_tile=256, kv_tile=256,
                      vmem_limit=40 * 1024 * 1024):
    # TODO(synk): mask (masked_fill), dropout > 0, cross-attention context and
    # the 2-D input path of the PyTorch module are not implemented here.
    B, N, Dq = x.shape
    wq, wkv, wo, bo = params["wq"], params["wkv"], params["wo"], params["bo"]
    inner = wq.shape[0]
    dh = inner // heads
    scale = float(dh) ** (-0.5)
    dh_pad = _round_up(dh, 128)        # full-width lane blocks per head
    dq_pad = _round_up(Dq, 128)        # lane-dense output writeback
    hd = heads * dh_pad
    out_dtype = x.dtype

    def pad_heads(w_t):
        # (Dq, heads*dh) -> (Dq, heads*dh_pad): per-head zero-pad to 128 lanes.
        w3 = w_t.reshape(Dq, heads, dh)
        w3 = jnp.pad(w3, ((0, 0), (0, 0), (0, dh_pad - dh)))
        return w3.reshape(Dq, hd)

    # PyTorch Linear weights are (out, in); kernels consume (in, out).
    # Softmax scale is folded into Wq (free at runtime).
    wq_t = pad_heads(wq.T * scale)
    wk_t = pad_heads(wkv[:inner].T)
    wv_t = pad_heads(wkv[inner:].T)
    w_cat = jnp.concatenate([wq_t, wk_t, wv_t], axis=1).astype(compute_dtype)

    # Output projection: wo.T rows grouped per head, padded to (dh_pad, dq_pad).
    wo_p = wo.T.reshape(heads, dh, Dq)
    wo_p = jnp.pad(wo_p, ((0, 0), (0, dh_pad - dh), (0, dq_pad - Dq)))
    wo_p = wo_p.reshape(hd, dq_pad).astype(compute_dtype)
    bo_p = jnp.pad(bo, (0, dq_pad - Dq)).reshape(1, dq_pad).astype(jnp.float32)

    q, k, v = _project(x, w_cat, hd=hd, compute_dtype=compute_dtype,
                       seq_tile=seq_tile, vmem_limit=vmem_limit)
    out = _attention(q, k, v, wo_p, bo_p, heads=heads, dh_pad=dh_pad,
                     dq_pad=dq_pad, out_dtype=out_dtype, q_tile=q_tile,
                     kv_tile=kv_tile, vmem_limit=vmem_limit)
    return out[..., :Dq] if dq_pad != Dq else out


# ----------------------------------------------------------------------------
# Pure-JAX reference for sanity checking.
# ----------------------------------------------------------------------------
def _attention_reference(x, params, heads):
    B, N, Dq = x.shape
    wq, wkv, wo, bo = params["wq"], params["wkv"], params["wo"], params["bo"]
    inner = wq.shape[0]
    dh = inner // heads
    q = x @ wq.T
    kv = x @ wkv.T
    k, v = kv[..., :inner], kv[..., inner:]

    def split(t):
        return t.reshape(B, N, heads, dh).transpose(0, 2, 1, 3)

    qh, kh, vh = split(q), split(k), split(v)
    sim = jnp.einsum("bhid,bhjd->bhij", qh, kh) * (float(dh) ** (-0.5))
    attn = jax.nn.softmax(sim, axis=-1)
    oh = jnp.einsum("bhij,bhjd->bhid", attn, vh)
    y = oh.transpose(0, 2, 1, 3).reshape(B, N, inner)
    return y @ wo.T + bo


def _make_params(key, query_dim, inner_dim):
    kq, kkv, kwo, kbo = jax.random.split(key, 4)
    return {
        "wq": 0.05 * jax.random.normal(kq, (inner_dim, query_dim), jnp.float32),
        "wkv": 0.05 * jax.random.normal(kkv, (2 * inner_dim, query_dim), jnp.float32),
        "wo": 0.05 * jax.random.normal(kwo, (query_dim, inner_dim), jnp.float32),
        "bo": 0.05 * jax.random.normal(kbo, (query_dim,), jnp.float32),
    }


def _check(x, params, heads, **kw):
    fwd = jax.jit(functools.partial(attention_forward, heads=heads, **kw))
    out = fwd(x, params)
    jax.block_until_ready(out)
    assert out.shape == x.shape[:2] + (params["wo"].shape[0],), out.shape
    assert out.dtype == x.dtype, out.dtype
    ref = _attention_reference(x, params, heads)
    max_err = float(jnp.max(jnp.abs(out - ref)))
    assert jnp.allclose(out, ref, atol=2e-2, rtol=5e-2), max_err


if __name__ == "__main__":
    key = jax.random.PRNGKey(0)
    k1, k2, k3, k4 = jax.random.split(key, 4)

    # Case 1: small shapes consistent with the module's forward
    # (single KV tile, single q tile).
    B, N, query_dim, heads, dim_head = 2, 8, 32, 2, 16
    x1 = jax.random.normal(k1, (B, N, query_dim), dtype=jnp.float32)
    p1 = _make_params(k2, query_dim, heads * dim_head)
    _check(x1, p1, heads)

    # Case 2: exercises the online-softmax KV loop and the per-head output
    # accumulation (multiple q / kv tiles, multiple heads).
    B, N, query_dim, heads, dim_head = 2, 64, 16, 2, 8
    x2 = jax.random.normal(k3, (B, N, query_dim), dtype=jnp.float32)
    p2 = _make_params(k4, query_dim, heads * dim_head)
    _check(x2, p2, heads, q_tile=32, kv_tile=16, seq_tile=32)

    print("KERNEL_OK")
</pallas_src>

<mosaic_0001>
module attributes {stable_mosaic.version = 11 : i64} {
  func.func @_proj_kernel(%arg0: i32, %arg1: i32, %arg2: memref<1x8x32xf32, #tpu.memory_space<vmem>>, %arg3: memref<32x768xbf16, #tpu.memory_space<vmem>>, %arg4: memref<1x8x256xbf16, #tpu.memory_space<vmem>>, %arg5: memref<1x8x256xbf16, #tpu.memory_space<vmem>>, %arg6: memref<1x8x256xbf16, #tpu.memory_space<vmem>>) attributes {dimension_semantics = [#tpu.dimension_semantics<parallel>, #tpu.dimension_semantics<parallel>], iteration_bounds = array<i64: 2, 1>, scalar_prefetch = 0 : i64, scratch_operands = 0 : i64, tpu.core_type = #tpu.core_type<tc>, window_params = [{transform_indices = @transform_0, window_bounds = array<i64: 1, 8, 32>}, {pipeline_mode = #tpu.pipeline_mode<synchronous>, transform_indices = @transform_1, window_bounds = array<i64: 32, 768>}, {transform_indices = @transform_2, window_bounds = array<i64: 1, 8, 256>}, {transform_indices = @transform_3, window_bounds = array<i64: 1, 8, 256>}, {transform_indices = @transform_4, window_bounds = array<i64: 1, 8, 256>}]} {
    %c0 = arith.constant 0 : index
    %c0_0 = arith.constant 0 : index
    %c0_1 = arith.constant 0 : index
    %0 = vector.load %arg2[%c0, %c0_0, %c0_1] : memref<1x8x32xf32, #tpu.memory_space<vmem>>, vector<1x8x32xf32>
    %1 = vector.shape_cast %0 : vector<1x8x32xf32> to vector<8x32xf32>
    %2 = arith.truncf %1 : vector<8x32xf32> to vector<8x32xbf16>
    %c0_2 = arith.constant 0 : index
    %c0_3 = arith.constant 0 : index
    %3 = vector.load %arg3[%c0_2, %c0_3] : memref<32x768xbf16, #tpu.memory_space<vmem>>, vector<32x768xbf16>
    %cst = arith.constant dense<0.000000e+00> : vector<8x768xf32>
    %4 = tpu.matmul %2, %3, %cst {dimension_numbers = #tpu.dot_dimension_numbers<[1], [0], [0], [1], [0, 0, 1, 1], [], []>} : vector<8x32xbf16>, vector<32x768xbf16>, vector<8x768xf32> -> vector<8x768xf32>
    %5 = vector.extract_strided_slice %4 {offsets = [0, 0], sizes = [8, 256], strides = [1, 1]} : vector<8x768xf32> to vector<8x256xf32>
    %6 = arith.truncf %5 : vector<8x256xf32> to vector<8x256xbf16>
    %c0_4 = arith.constant 0 : index
    %c0_5 = arith.constant 0 : index
    %c0_6 = arith.constant 0 : index
    %7 = vector.load %arg4[%c0_4, %c0_5, %c0_6] : memref<1x8x256xbf16, #tpu.memory_space<vmem>>, vector<1x8x256xbf16>
    %8 = vector.shape_cast %7 : vector<1x8x256xbf16> to vector<8x256xbf16>
    %9 = vector.shape_cast %6 : vector<8x256xbf16> to vector<1x8x256xbf16>
    tpu.vector_store %arg4[%c0_4, %c0_5, %c0_6], %9 {strides = array<i32>} : memref<1x8x256xbf16, #tpu.memory_space<vmem>>, vector<1x8x256xbf16>,
    %10 = vector.extract_strided_slice %4 {offsets = [0, 256], sizes = [8, 256], strides = [1, 1]} : vector<8x768xf32> to vector<8x256xf32>
    %11 = arith.truncf %10 : vector<8x256xf32> to vector<8x256xbf16>
    %c0_7 = arith.constant 0 : index
    %c0_8 = arith.constant 0 : index
    %c0_9 = arith.constant 0 : index
    %12 = vector.load %arg5[%c0_7, %c0_8, %c0_9] : memref<1x8x256xbf16, #tpu.memory_space<vmem>>, vector<1x8x256xbf16>
    %13 = vector.shape_cast %12 : vector<1x8x256xbf16> to vector<8x256xbf16>
    %14 = vector.shape_cast %11 : vector<8x256xbf16> to vector<1x8x256xbf16>
    tpu.vector_store %arg5[%c0_7, %c0_8, %c0_9], %14 {strides = array<i32>} : memref<1x8x256xbf16, #tpu.memory_space<vmem>>, vector<1x8x256xbf16>,
    %15 = vector.extract_strided_slice %4 {offsets = [0, 512], sizes = [8, 256], strides = [1, 1]} : vector<8x768xf32> to vector<8x256xf32>
    %16 = arith.truncf %15 : vector<8x256xf32> to vector<8x256xbf16>
    %c0_10 = arith.constant 0 : index
    %c0_11 = arith.constant 0 : index
    %c0_12 = arith.constant 0 : index
    %17 = vector.load %arg6[%c0_10, %c0_11, %c0_12] : memref<1x8x256xbf16, #tpu.memory_space<vmem>>, vector<1x8x256xbf16>
    %18 = vector.shape_cast %17 : vector<1x8x256xbf16> to vector<8x256xbf16>
    %19 = vector.shape_cast %16 : vector<8x256xbf16> to vector<1x8x256xbf16>
    tpu.vector_store %arg6[%c0_10, %c0_11, %c0_12], %19 {strides = array<i32>} : memref<1x8x256xbf16, #tpu.memory_space<vmem>>, vector<1x8x256xbf16>,
    return
  }
  func.func @transform_0(%arg0: i32, %arg1: i32) -> (i32, i32, i32) {
    %c0_i32 = arith.constant 0 : i32
    %c0_i32_0 = arith.constant 0 : i32
    return %arg0, %arg1, %c0_i32 : i32, i32, i32
  }
  func.func @transform_1(%arg0: i32, %arg1: i32) -> (i32, i32) {
    %c0_i32 = arith.constant 0 : i32
    %c0_i32_0 = arith.constant 0 : i32
    %c0_i32_1 = arith.constant 0 : i32
    return %c0_i32, %c0_i32_0 : i32, i32
  }
  func.func @transform_2(%arg0: i32, %arg1: i32) -> (i32, i32, i32) {
    %c0_i32 = arith.constant 0 : i32
    %c0_i32_0 = arith.constant 0 : i32
    return %arg0, %arg1, %c0_i32 : i32, i32, i32
  }
  func.func @transform_3(%arg0: i32, %arg1: i32) -> (i32, i32, i32) {
    %c0_i32 = arith.constant 0 : i32
    %c0_i32_0 = arith.constant 0 : i32
    return %arg0, %arg1, %c0_i32 : i32, i32, i32
  }
  func.func @transform_4(%arg0: i32, %arg1: i32) -> (i32, i32, i32) {
    %c0_i32 = arith.constant 0 : i32
    %c0_i32_0 = arith.constant 0 : i32
    return %arg0, %arg1, %c0_i32 : i32, i32, i32
  }
}

module attributes {stable_mosaic.version = 11 : i64} {
  func.func @_attn_kernel(%arg0: i32, %arg1: i32, %arg2: i32, %arg3: i32, %arg4: memref<1x8x128xbf16, #tpu.memory_space<vmem>>, %arg5: memref<1x8x128xbf16, #tpu.memory_space<vmem>>, %arg6: memref<1x8x128xbf16, #tpu.memory_space<vmem>>, %arg7: memref<128x128xbf16, #tpu.memory_space<vmem>>, %arg8: memref<1x128xf32, #tpu.memory_space<vmem>>, %arg9: memref<1x8x128xf32, #tpu.memory_space<vmem>>, %arg10: memref<8x1xf32, #tpu.memory_space<vmem>>, %arg11: memref<8x1xf32, #tpu.memory_space<vmem>>, %arg12: memref<8x128xf32, #tpu.memory_space<vmem>>, %arg13: memref<8x128xf32, #tpu.memory_space<vmem>>) attributes {dimension_semantics = [#tpu.dimension_semantics<parallel>, #tpu.dimension_semantics<parallel>, #tpu.dimension_semantics<arbitrary>, #tpu.dimension_semantics<arbitrary>], iteration_bounds = array<i64: 2, 1, 2, 1>, scalar_prefetch = 0 : i64, scratch_operands = 4 : i64, tpu.core_type = #tpu.core_type<tc>, window_params = [{transform_indices = @transform_0, window_bounds = array<i64: 1, 8, 128>}, {transform_indices = @transform_1, window_bounds = array<i64: 1, 8, 128>}, {transform_indices = @transform_2, window_bounds = array<i64: 1, 8, 128>}, {transform_indices = @transform_3, window_bounds = array<i64: 128, 128>}, {pipeline_mode = #tpu.pipeline_mode<synchronous>, transform_indices = @transform_4, window_bounds = array<i64: 1, 128>}, {transform_indices = @transform_5, window_bounds = array<i64: 1, 8, 128>}]} {
    %c0_i32 = arith.constant 0 : i32
    %0 = arith.cmpi eq, %arg2, %c0_i32 : i32
    %c0_i32_0 = arith.constant 0 : i32
    %1 = arith.cmpi eq, %arg3, %c0_i32_0 : i32
    %2 = arith.andi %0, %1 : i1
    %3 = arith.extui %2 : i1 to i32
    %c0_i32_1 = arith.constant 0 : i32
    %4 = arith.cmpi ne, %3, %c0_i32_1 : i32
    scf.if %4 {
      %cst_31 = arith.constant 0.000000e+00 : f32
      %46 = vector.broadcast %cst_31 : f32 to vector<8x128xf32>
      %c0_32 = arith.constant 0 : index
      %c0_33 = arith.constant 0 : index
      %47 = vector.load %arg13[%c0_32, %c0_33] : memref<8x128xf32, #tpu.memory_space<vmem>>, vector<8x128xf32>
      tpu.vector_store %arg13[%c0_32, %c0_33], %46 {strides = array<i32>} : memref<8x128xf32, #tpu.memory_space<vmem>>, vector<8x128xf32>,
    } else {
    }
    %c0_i32_2 = arith.constant 0 : i32
    %5 = arith.cmpi eq, %arg3, %c0_i32_2 : i32
    %6 = arith.extui %5 : i1 to i32
    %c0_i32_3 = arith.constant 0 : i32
    %7 = arith.cmpi ne, %6, %c0_i32_3 : i32
    scf.if %7 {
      %cst_31 = arith.constant 0xFF800000 : f32
      %46 = vector.broadcast %cst_31 : f32 to vector<8x1xf32>
      %c0_32 = arith.constant 0 : index
      %c0_33 = arith.constant 0 : index
      %47 = vector.load %arg10[%c0_32, %c0_33] : memref<8x1xf32, #tpu.memory_space<vmem>>, vector<8x1xf32>
      tpu.vector_store %arg10[%c0_32, %c0_33], %46 {strides = array<i32>} : memref<8x1xf32, #tpu.memory_space<vmem>>, vector<8x1xf32>,
      %cst_34 = arith.constant 0.000000e+00 : f32
      %48 = vector.broadcast %cst_34 : f32 to vector<8x1xf32>
      %c0_35 = arith.constant 0 : index
      %c0_36 = arith.constant 0 : index
      %49 = vector.load %arg11[%c0_35, %c0_36] : memref<8x1xf32, #tpu.memory_space<vmem>>, vector<8x1xf32>
      tpu.vector_store %arg11[%c0_35, %c0_36], %48 {strides = array<i32>} : memref<8x1xf32, #tpu.memory_space<vmem>>, vector<8x1xf32>,
      %cst_37 = arith.constant 0.000000e+00 : f32
      %50 = vector.broadcast %cst_37 : f32 to vector<8x128xf32>
      %c0_38 = arith.constant 0 : index
      %c0_39 = arith.constant 0 : index
      %51 = vector.load %arg12[%c0_38, %c0_39] : memref<8x128xf32, #tpu.memory_space<vmem>>, vector<8x128xf32>
      tpu.vector_store %arg12[%c0_38, %c0_39], %50 {strides = array<i32>} : memref<8x128xf32, #tpu.memory_space<vmem>>, vector<8x128xf32>,
    } else {
    }
    %c0 = arith.constant 0 : index
    %c0_4 = arith.constant 0 : index
    %c0_5 = arith.constant 0 : index
    %8 = vector.load %arg4[%c0, %c0_4, %c0_5] : memref<1x8x128xbf16, #tpu.memory_space<vmem>>, vector<1x8x128xbf16>
    %9 = vector.shape_cast %8 : vector<1x8x128xbf16> to vector<8x128xbf16>
    %c0_6 = arith.constant 0 : index
    %c0_7 = arith.constant 0 : index
    %c0_8 = arith.constant 0 : index
    %10 = vector.load %arg5[%c0_6, %c0_7, %c0_8] : memref<1x8x128xbf16, #tpu.memory_space<vmem>>, vector<1x8x128xbf16>
    %11 = vector.shape_cast %10 : vector<1x8x128xbf16> to vector<8x128xbf16>
    %c0_9 = arith.constant 0 : index
    %c0_10 = arith.constant 0 : index
    %c0_11 = arith.constant 0 : index
    %12 = vector.load %arg6[%c0_9, %c0_10, %c0_11] : memref<1x8x128xbf16, #tpu.memory_space<vmem>>, vector<1x8x128xbf16>
    %13 = vector.shape_cast %12 : vector<1x8x128xbf16> to vector<8x128xbf16>
    %cst = arith.constant dense<0.000000e+00> : vector<8x8xf32>
    %14 = tpu.matmul %9, %11, %cst {dimension_numbers = #tpu.dot_dimension_numbers<[1], [1], [0], [0], [0, 0, 1, 0], [], []>} : vector<8x128xbf16>, vector<8x128xbf16>, vector<8x8xf32> -> vector<8x8xf32>
    %c0_12 = arith.constant 0 : index
    %c0_13 = arith.constant 0 : index
    %15 = vector.load %arg10[%c0_12, %c0_13] : memref<8x1xf32, #tpu.memory_space<vmem>>, vector<8x1xf32>
    %cst_14 = arith.constant dense<0xFF800000> : vector<8xf32>
    %16 = vector.multi_reduction <maximumf>, %14, %cst_14 [1] : vector<8x8xf32> to vector<8xf32>
    %17 = vector.shape_cast %16 : vector<8xf32> to vector<8x1xf32>
    %18 = arith.maximumf %15, %17 : vector<8x1xf32>
    %19 = arith.subf %15, %18 : vector<8x1xf32>
    %20 = math.exp %19 : vector<8x1xf32>
    %21 = vector.broadcast %18 : vector<8x1xf32> to vector<8x8xf32>
    %22 = arith.subf %14, %21 : vector<8x8xf32>
    %23 = math.exp %22 : vector<8x8xf32>
    %c0_15 = arith.constant 0 : index
    %c0_16 = arith.constant 0 : index
    %24 = vector.load %arg11[%c0_15, %c0_16] : memref<8x1xf32, #tpu.memory_space<vmem>>, vector<8x1xf32>
    %25 = arith.mulf %20, %24 : vector<8x1xf32>
    %cst_17 = arith.constant dense<0.000000e+00> : vector<8xf32>
    %26 = vector.multi_reduction <add>, %23, %cst_17 [1] : vector<8x8xf32> to vector<8xf32>
    %27 = vector.shape_cast %26 : vector<8xf32> to vector<8x1xf32>
    %28 = arith.addf %25, %27 : vector<8x1xf32>
    %c0_18 = arith.constant 0 : index
    %c0_19 = arith.constant 0 : index
    %29 = vector.load %arg11[%c0_18, %c0_19] : memref<8x1xf32, #tpu.memory_space<vmem>>, vector<8x1xf32>
    tpu.vector_store %arg11[%c0_18, %c0_19], %28 {strides = array<i32>} : memref<8x1xf32, #tpu.memory_space<vmem>>, vector<8x1xf32>,
    %c0_20 = arith.constant 0 : index
    %c0_21 = arith.constant 0 : index
    %30 = vector.load %arg12[%c0_20, %c0_21] : memref<8x128xf32, #tpu.memory_space<vmem>>, vector<8x128xf32>
    %31 = vector.broadcast %20 : vector<8x1xf32> to vector<8x128xf32>
    %32 = arith.mulf %31, %30 : vector<8x128xf32>
    %33 = arith.truncf %23 : vector<8x8xf32> to vector<8x8xbf16>
    %cst_22 = arith.constant dense<0.000000e+00> : vector<8x128xf32>
    %34 = tpu.matmul %33, %13, %cst_22 {dimension_numbers = #tpu.dot_dimension_numbers<[1], [0], [0], [1], [0, 0, 1, 1], [], []>} : vector<8x8xbf16>, vector<8x128xbf16>, vector<8x128xf32> -> vector<8x128xf32>
    %35 = arith.addf %32, %34 : vector<8x128xf32>
    %c0_23 = arith.constant 0 : index
    %c0_24 = arith.constant 0 : index
    %36 = vector.load %arg12[%c0_23, %c0_24] : memref<8x128xf32, #tpu.memory_space<vmem>>, vector<8x128xf32>
    tpu.vector_store %arg12[%c0_23, %c0_24], %35 {strides = array<i32>} : memref<8x128xf32, #tpu.memory_space<vmem>>, vector<8x128xf32>,
    %c0_25 = arith.constant 0 : index
    %c0_26 = arith.constant 0 : index
    %37 = vector.load %arg10[%c0_25, %c0_26] : memref<8x1xf32, #tpu.memory_space<vmem>>, vector<8x1xf32>
    tpu.vector_store %arg10[%c0_25, %c0_26], %18 {strides = array<i32>} : memref<8x1xf32, #tpu.memory_space<vmem>>, vector<8x1xf32>,
    %c0_i32_27 = arith.constant 0 : i32
    %38 = arith.cmpi eq, %arg3, %c0_i32_27 : i32
    %39 = arith.extui %38 : i1 to i32
    %c0_i32_28 = arith.constant 0 : i32
    %40 = arith.cmpi ne, %39, %c0_i32_28 : i32
    scf.if %40 {
      %c0_31 = arith.constant 0 : index
      %c0_32 = arith.constant 0 : index
      %46 = vector.load %arg12[%c0_31, %c0_32] : memref<8x128xf32, #tpu.memory_space<vmem>>, vector<8x128xf32>
      %c0_33 = arith.constant 0 : index
      %c0_34 = arith.constant 0 : index
      %47 = vector.load %arg11[%c0_33, %c0_34] : memref<8x1xf32, #tpu.memory_space<vmem>>, vector<8x1xf32>
      %48 = tpu.reciprocal %47 {approx = true} : vector<8x1xf32> -> vector<8x1xf32>
      %49 = vector.broadcast %48 : vector<8x1xf32> to vector<8x128xf32>
      %50 = arith.mulf %46, %49 : vector<8x128xf32>
      %51 = arith.truncf %50 : vector<8x128xf32> to vector<8x128xbf16>
      %c0_35 = arith.constant 0 : index
      %c0_36 = arith.constant 0 : index
      %52 = vector.load %arg13[%c0_35, %c0_36] : memref<8x128xf32, #tpu.memory_space<vmem>>, vector<8x128xf32>
      %c0_37 = arith.constant 0 : index
      %c0_38 = arith.constant 0 : index
      %53 = vector.load %arg7[%c0_37, %c0_38] : memref<128x128xbf16, #tpu.memory_space<vmem>>, vector<128x128xbf16>
      %cst_39 = arith.constant dense<0.000000e+00> : vector<8x128xf32>
      %54 = tpu.matmul %51, %53, %cst_39 {dimension_numbers = #tpu.dot_dimension_numbers<[1], [0], [0], [1], [0, 0, 1, 1], [], []>} : vector<8x128xbf16>, vector<128x128xbf16>, vector<8x128xf32> -> vector<8x128xf32>
      %55 = arith.addf %52, %54 : vector<8x128xf32>
      %c0_40 = arith.constant 0 : index
      %c0_41 = arith.constant 0 : index
      %56 = vector.load %arg13[%c0_40, %c0_41] : memref<8x128xf32, #tpu.memory_space<vmem>>, vector<8x128xf32>
      tpu.vector_store %arg13[%c0_40, %c0_41], %55 {strides = array<i32>} : memref<8x128xf32, #tpu.memory_space<vmem>>, vector<8x128xf32>,
    } else {
    }
    %c1_i32 = arith.constant 1 : i32
    %41 = arith.cmpi eq, %arg2, %c1_i32 : i32
    %c0_i32_29 = arith.constant 0 : i32
    %42 = arith.cmpi eq, %arg3, %c0_i32_29 : i32
    %43 = arith.andi %41, %42 : i1
    %44 = arith.extui %43 : i1 to i32
    %c0_i32_30 = arith.constant 0 : i32
    %45 = arith.cmpi ne, %44, %c0_i32_30 : i32
    scf.if %45 {
      %c0_31 = arith.constant 0 : index
      %c0_32 = arith.constant 0 : index
      %46 = vector.load %arg13[%c0_31, %c0_32] : memref<8x128xf32, #tpu.memory_space<vmem>>, vector<8x128xf32>
      %c0_33 = arith.constant 0 : index
      %c0_34 = arith.constant 0 : index
      %47 = vector.load %arg8[%c0_33, %c0_34] : memref<1x128xf32, #tpu.memory_space<vmem>>, vector<1x128xf32>
      %48 = vector.broadcast %47 : vector<1x128xf32> to vector<8x128xf32>
      %49 = arith.addf %46, %48 : vector<8x128xf32>
      %c0_35 = arith.constant 0 : index
      %c0_36 = arith.constant 0 : index
      %c0_37 = arith.constant 0 : index
      %50 = vector.load %arg9[%c0_35, %c0_36, %c0_37] : memref<1x8x128xf32, #tpu.memory_space<vmem>>, vector<1x8x128xf32>
      %51 = vector.shape_cast %50 : vector<1x8x128xf32> to vector<8x128xf32>
      %52 = vector.shape_cast %49 : vector<8x128xf32> to vector<1x8x128xf32>
      tpu.vector_store %arg9[%c0_35, %c0_36, %c0_37], %52 {strides = array<i32>} : memref<1x8x128xf32, #tpu.memory_space<vmem>>, vector<1x8x128xf32>,
    } else {
    }
    return
  }
  func.func @transform_0(%arg0: i32, %arg1: i32, %arg2: i32, %arg3: i32) -> (i32, i32, i32) {
    %c0_i32 = arith.constant 0 : i32
    return %arg0, %arg1, %arg2 : i32, i32, i32
  }
  func.func @transform_1(%arg0: i32, %arg1: i32, %arg2: i32, %arg3: i32) -> (i32, i32, i32) {
    %c0_i32 = arith.constant 0 : i32
    return %arg0, %arg3, %arg2 : i32, i32, i32
  }
  func.func @transform_2(%arg0: i32, %arg1: i32, %arg2: i32, %arg3: i32) -> (i32, i32, i32) {
    %c0_i32 = arith.constant 0 : i32
    return %arg0, %arg3, %arg2 : i32, i32, i32
  }
  func.func @transform_3(%arg0: i32, %arg1: i32, %arg2: i32, %arg3: i32) -> (i32, i32) {
    %c0_i32 = arith.constant 0 : i32
    %c0_i32_0 = arith.constant 0 : i32
    return %arg2, %c0_i32 : i32, i32
  }
  func.func @transform_4(%arg0: i32, %arg1: i32, %arg2: i32, %arg3: i32) -> (i32, i32) {
    %c0_i32 = arith.constant 0 : i32
    %c0_i32_0 = arith.constant 0 : i32
    %c0_i32_1 = arith.constant 0 : i32
    return %c0_i32, %c0_i32_0 : i32, i32
  }
  func.func @transform_5(%arg0: i32, %arg1: i32, %arg2: i32, %arg3: i32) -> (i32, i32, i32) {
    %c0_i32 = arith.constant 0 : i32
    %c0_i32_0 = arith.constant 0 : i32
    return %arg0, %arg1, %c0_i32 : i32, i32, i32
  }
}

</mosaic_0001>

<bundles_post_ra>
// kernel: attention_forward.2
= control target key start
LH: loop header
LB: loop body
LE: loop exit
PB: predicated region body
PF: predicated region fallthrough
CT: control target
= control target key end

     0   :  { %s825_s15 = smov 0   ;;  %s827_s16 = smov 0   ;;  %s906_s0 = inlined_call_operand.vmem [shape: f32[2,8,32], index: 0, kind: input, shape index: {}]   ;;  %s907_s1 = inlined_call_operand.vmem [shape: bf16[32,768], index: 1, kind: input, shape index: {}]   ;;  %s908_s2 = inlined_call_operand.vmem [shape: bf16[2,8,256], index: 2, kind: output, shape index: {0}]   ;;  %s909_s3 = inlined_call_operand.vmem [shape: bf16[2,8,256], index: 3, kind: output, shape index: {1}]   ;;  %s910_s4 = inlined_call_operand.vmem [shape: bf16[2,8,256], index: 4, kind: output, shape index: {2}]  }
   0x1   :  { %s829_s17 = smov 0  }
   0x2 LB: > { %s27_s18 = sadd.s32 1, %s793_s16  ;;  %p698_p0 = scmp.ge.s32.totalorder %s797_s17, 1  ;;  %s797_s17 = sphi %s829_s17, %s15_s17   ;;  %s793_s16 = sphi %s827_s16, %s912_s16   ;;  %s789_s15 = sphi %s825_s15, %s911_s15  }
   0x3   : > { %p29_p1 = scmp.ge.s32.totalorder %s27_s18, 2  ;;  %p189_p2 = scmp.lt.s32.totalorder %s797_s17, 3 }
   0x5   : > { %s914_s18 = smov (%p29_p1, %s27_s18), 0  ;;  %p190_p3 = pnand %p698_p0, %p189_p2 }
   0x6   : > { %v757_v0 = vld [vmem:[%s907_s1 + $0x4] ss:$24 sps:$4 sm:$0xff] (!%p190_p3)   ;;  %p239_p4 = scmp.lt.s32.totalorder (!%p190_p3), %s789_s15, 1  ;;  %v759_v1 = vld [vmem:[%s907_s1] ss:$24 sps:$4 sm:$0xff] (!%p190_p3)   ;;  %v799_v2 = vmov (!%p190_p3), 0  }
   0x7   : > { %193 = sbr.rel (%p190_p3) target bundleno = 244 (0xf4), region = 28  ;;  %384 = vmatprep.mubr.bf16.mxu0 (!%p190_p3), %v799_v2  ;;  %425 = vmatprep.mubr.bf16.mxu1 (!%p190_p3), %v799_v2  ;;  %v760_v3 = vld [vmem:[%s907_s1 + $0x34] ss:$24 sps:$4 sm:$0xff] (!%p190_p3)   ;;  %v762_v4 = vld [vmem:[%s907_s1 + $0x30] ss:$24 sps:$4 sm:$0xff] (!%p190_p3)   ;;  %vm348_vm0 = vcmask (!%p190_p3), 261120  }
   0x8   : > { %352 = vmatprep.subr.bf16.mxu0 (!%p190_p3), %v757_v0  ;;  %v763_v5 = vld [vmem:[%s907_s1 + $0xc] ss:$24 sps:$4 sm:$0xff] (!%p190_p3)   ;;  %v765_v6 = vld [vmem:[%s907_s1 + $0x8] ss:$24 sps:$4 sm:$0xff] (!%p190_p3)   ;;  %v769_v9 = vld [vmem:[%s907_s1 + $0x3c] ss:$24 sps:$4 sm:$0xff] (!%p190_p3)  }
   0x9   : > { %353 = vmatpush1.bf16.msra.mxu0 (!%p190_p3), %v759_v1  ;;  %393 = vmatprep.subr.bf16.mxu1 (!%p190_p3), %v763_v5  ;;  %v768_v7 = vld [vmem:[%s907_s1 + $0x14] ss:$24 sps:$4 sm:$0xff] (!%p190_p3)   ;;  %v771_v10 = vld [vmem:[%s907_s1 + $0x38] ss:$24 sps:$4 sm:$0xff] (!%p190_p3)   ;;  %v774_v13 = vld [vmem:[%s907_s1 + $0x44] ss:$24 sps:$4 sm:$0xff] (!%p190_p3)  }
   0xa   : > { %354 = vmatprep.subr.bf16.mxu0 (!%p190_p3), %v760_v3  ;;  %394 = vmatpush1.bf16.msra.mxu1 (!%p190_p3), %v765_v6  ;;  %v766_v12 = vld [vmem:[%s907_s1 + $0x10] ss:$24 sps:$4 sm:$0xff] (!%p190_p3)   ;;  %v772_v14 = vld [vmem:[%s907_s1 + $0x40] ss:$24 sps:$4 sm:$0xff] (!%p190_p3)  }
   0xb   : > { %395 = vmatprep.subr.bf16.mxu1 (!%p190_p3), %v769_v9 }
   0xd   : > { %355 = vmatpush1.bf16.msra.mxu0 (!%p190_p3), %v762_v4 }
   0xe   : > { %s916_s15 = smov (!%p239_p4, %s789_s15), 1  ;;  %434 = vmatprep.subr.bf16.mxu0 %v768_v7  ;;  %396 = vmatpush1.bf16.msra.mxu1 %v771_v10 }
   0xf   : > { %s861_s5 = sshll.u32 %s916_s15, 3 }
  0x10   : > { %s245_s8 = scalar_lea.vmem %s906_s0, %s861_s5  ;;  %s254_s26 = scalar_lea.vmem %s908_s2, %s861_s5 }
  0x11   : > { %v274_v8 = vld [vmem:[%s245_s8] sm:$0xff]  ;;  %s263_s29 = scalar_lea.vmem %s909_s3, %s861_s5  ;;  %s272_s7 = scalar_lea.vmem %s910_s4, %s861_s5 }
  0x12   : > { %v275_v11 = vpack.c.bf16 %v274_v8, %v274_v8 }
  0x14   : > { %718 = vmatmul.mubr.msk.bf16.vlgmr.msra.gmra.mrb[0].mxu0 %vm348_vm0, %v275_v11  ;;  %719 = vmatmul.mubr.msk.bf16.vlgmr.msra.gmra.mrb[0].mxu1 %vm348_vm0, %v275_v11 }
  0x15   : > { %435 = vmatpush1.bf16.msra.mxu0 %v766_v12  ;;  %466 = vmatprep.mubr.bf16.mxu0 %v799_v2 }
  0x16   : > { %436 = vmatprep.subr.bf16.mxu0 %v774_v13 }
  0x19   : > { %437 = vmatpush1.bf16.msra.mxu0 %v772_v14 }
  0x1c   : > { %720 = vmatmul.mubr.msk.bf16.vlgmr.msra.gmra.mrb[4].mxu0 %vm348_vm0, %v275_v11 }
  0xe7   : > { %v386_v15 = vpop.f32.mrb[0].mxu0  ;;  %v427_v20 = vpop.f32.mrb[0].mxu1 }
  0xe8   : > { %v388_v16 = vpop.f32.mrb[1].mxu0  ;;  %v429_v21 = vpop.f32.mrb[1].mxu1 }
  0xe9   : > { %v729_v17 = vpack.c.bf16 %v388_v16, %v386_v15  ;;  %v390_v18 = vpop.f32.mrb[2].mxu0  ;;  %v730_v22 = vpack.c.bf16 %v429_v21, %v427_v20  ;;  %v431_v23 = vpop.f32.mrb[2].mxu1 }
  0xea   : > { %v391_v19 = vpop.f32.mrb[3].mxu0  ;;  %v432_v24 = vpop.f32.mrb[3].mxu1 }
  0xeb   : > { %483 = vst [vmem:[%s254_s26] sm:$0xff] %v729_v17  ;;  %492 = vst [vmem:[%s263_s29] sm:$0xff] %v730_v22 }
  0xef   : > { %v468_v25 = vpop.f32.mrb[4].mxu0 }
  0xf0   : > { %v470_v26 = vpop.f32.mrb[5].mxu0 }
  0xf1   : > { %v731_v27 = vpack.c.bf16 %v470_v26, %v468_v25  ;;  %v472_v28 = vpop.f32.mrb[6].mxu0 }
  0xf2   : > { %v473_v29 = vpop.f32.mrb[7].mxu0 }
  0xf3   : > { %501 = vst [vmem:[%s272_s7] sm:$0xff] %v731_v27 }
  0xf4 PF: > { %s15_s17 = sadd.s32 1, %s797_s17   ;;  %s911_s15 = smov %s793_s16 }
  0xf5   : > { %p12_p5 = scmp.ge.s32.totalorder %s15_s17, 4   ;;  %s912_s16 = smov %s914_s18 }
  0xf7   :  { %14 = sbr.rel (!%p12_p5) target bundleno = 2 (0x2), region = 82 }

// kernel: attention_forward.3
= control target key start
LH: loop header
LB: loop body
LE: loop exit
PB: predicated region body
PF: predicated region fallthrough
CT: control target
= control target key end

     0   :  { %10 = vsyncpa [#allocation7], 0  ;;  %s1324_s0 = inlined_call_operand.vmem [shape: bf16[2,8,256], index: 0, kind: input, shape index: {}]   ;;  %s1325_s1 = inlined_call_operand.vmem [shape: bf16[2,8,256], index: 1, kind: input, shape index: {}]   ;;  %s1326_s2 = inlined_call_operand.vmem [shape: bf16[2,8,256], index: 2, kind: input, shape index: {}]   ;;  %s1327_s3 = inlined_call_operand.vmem [shape: bf16[256,128], index: 3, kind: input, shape index: {}]   ;;  %s1328_s4 = inlined_call_operand.vmem [shape: f32[1,128], index: 4, kind: input, shape index: {}]   ;;  %s1329_s5 = inlined_call_operand.hbm [shape: f32[2,8,128], index: 5, kind: output, shape index: {}]  }
   0x1   :  { %12 = vsyncpa [#allocation7 + $0x1], 0  ;;  %s1129_s18 = smov 0   ;;  %s1131_s19 = smov 0  }
   0x2   :  { %s1133_s20 = smov 0   ;;  %s1135_s21 = smov 0  }
   0x3   :  { %s1137_s22 = smov 0   ;;  %s1139_s23 = smov 0  }
   0x4   :  { %s1141_s24 = smov 0   ;;  %s1143_s25 = smov 0  }
   0x5 LB: > { %1334 = sst [smem:[#allocation9_spill]] %s1083_s23  ;;  %s828_s26 = sadd.s32 4294967295, %s1091_s25   ;;  %s1091_s25 = sphi %s1143_s25, %s18_s25   ;;  %s1087_s24 = sphi %s1141_s24, %s1346_s24   ;;  %s1083_s23 = sphi %s1139_s23, %s1345_s23   ;;  %s1079_s22 = sphi %s1137_s22, %s1344_s22   ;;  %s1075_s21 = sphi %s1135_s21, %s1350_s21   ;;  %s1071_s20 = sphi %s1133_s20, %s1349_s20   ;;  %s1067_s19 = sphi %s1131_s19, %s1348_s19   ;;  %s1063_s18 = sphi %s1129_s18, %s1347_s18  }
   0x6   : > { %1335 = sst [smem:[#allocation10_spill]] %s1087_s24  ;;  %s829_s27 = sadd.s32 4294967294, %s1091_s25  }
   0x7   : > { %s36_s28 = sadd.s32 1, %s1083_s23  ;;  %s44_s29 = sadd.s32 1, %s1087_s24 }
   0x8   : > { %p38_p0 = scmp.ge.s32.totalorder %s36_s28, 2  ;;  %p200_p1 = scmp.ne.s32.totalorder %s1071_s20, %s1067_s19 }
   0x9   : > { %p201_p2 = scmp.eq.s32.totalorder %s828_s26, 3  ;;  %p206_p4 = scmp.ne.s32.totalorder %s1067_s19, %s1063_s18 }
   0xa   : > { %s1352_s28 = smov (%p38_p0, %s36_s28), 0  ;;  %s1354_s29 = smov (!%p38_p0, %s44_s29), %s1087_s24 }
   0xb   : > { %1336 = sst [smem:[#allocation11_spill]] %s1352_s28  ;;  %p1178_p3 = por %p201_p2, %p200_p1 }
   0xc   : > { %p46_p5 = scmp.ge.s32.totalorder %s1354_s29, 2  ;;  %p207_p6 = scmp.eq.s32.totalorder %s829_s27, 3 }
   0xd   : > { %p832_p7 = scmp.ge.s32.totalorder %s1091_s25, 1  ;;  %p282_p8 = scmp.lt.s32.totalorder %s1091_s25, 5 }
   0xe   : > { %s1356_s29 = smov (%p46_p5, %s1354_s29), 0  ;;  %p1188_p9 = por %p207_p6, %p206_p4 }
   0xf   : > { %1338 = sst [smem:[#allocation12_spill]] %s1356_s29  ;;  %p283_p10 = pnand %p832_p7, %p282_p8 }
  0x10   : > { %s185_s7 = ssub.s32 %s1087_s24, %s1356_s29  ;;  %s190_s8 = sadd.s32 1, %s1071_s20 }
  0x11   : > { %p188_p11 = scmp.eq.s32.totalorder %s185_s7, 0  ;;  %286 = sbr.rel (%p283_p10) target bundleno = 1092 (0x444), region = 40 }
  0x12   : > { %s1330_s10 = sand.u32 (!%p283_p10), 1, %s1067_s19   ;;  %p346_p12 = scmp.lt.s32.totalorder (!%p283_p10), %s1079_s22, 1 }
  0x13   : > { %s1196_s9 = scalar_select %p188_p11, %s1071_s20, %s190_s8  }
  0x14   : > { %s1202_s11 = sshll.u32 (!%p283_p10), %s1330_s10, 3  ;;  %p350_p13 = scmp.lt.s32.totalorder (!%p283_p10), %s1075_s21, 1 }
  0x15   : > { %1340 = sst [smem:[#allocation13_spill]] %s1196_s9  ;;  %s840_s12 = sshll.u32 (!%p283_p10), %s1075_s21, 4 }
  0x16   : > { %p383_p0 = scmp.lt.s32.totalorder (!%p283_p10), %s840_s12, 31  ;;  %p389_p1 = scmp.eq.s32.totalorder (!%p283_p10), %s1075_s21, 0 }
  0x17   : > { %s345_s9 = scalar_lea.vmem (!%p283_p10), [#allocation6], %s1202_s11 }
  0x18   : > { %s347_s13 = scalar_select %p346_p12, %s1079_s22, 1 }
  0x19   : > { %s351_s14 = scalar_select %p350_p13, %s1075_s21, 1 }
  0x1a   : > { %s834_s15 = sshll.u32 %s347_s13, 1  ;;  %s1358_s12 = smov (!%p383_p0, %s840_s12), 31  ;;  %v1093_v0 = vmov (%p389_p1), 0.0  }
  0x1b   : > { %s355_s16 = sadd.s32 %s834_s15, %s351_s14  ;;  %s841_s14 = sshll.u32 %s1358_s12, 2  ;;  %395 = vst [vmem:[#allocation5] sm:$0xff] (%p389_p1), %v1093_v0 }
  0x1c   : > { %s1209_s17 = sshll.u32 %s355_s16, 2  ;;  %s1226_s23 = scalar_lea.vmem %s1327_s3, %s841_s14 }
  0x1d   : > { %s357_s7 = scalar_lea.vmem %s1324_s0, %s1209_s17  ;;  %s369_s29 = scalar_lea.vmem %s1325_s1, %s1209_s17 }
  0x1e   : > { %s381_s13 = scalar_lea.vmem %s1326_s2, %s1209_s17  ;;  %394 = sbr.rel (!%p389_p1) target bundleno = 37 (0x25), region = 44 }
  0x25 PF: > { %v404_v1 = vld [vmem:[%s369_s29] sm:$0xf]  ;;  %v1094_v2 = vmov 0.0   ;;  %vm1095_vm0 = vmmov 0   ;;  %vm447_vm1 = vcmask 64512   ;;  %vm399_vm2 = vcmask 7168  }
  0x26   : > { %873 = vmatprep.subr.bf16.mxu0 %v1094_v2  ;;  %875 = vmatprep.mubr.msk.bf16.mxu0 %vm1095_vm0, %v1094_v2  ;;  %v403_v3 = vld [vmem:[%s357_s7] sm:$0xf]  ;;  %v1096_v9 = vmov -inf   ;;  %401 = vst.msk [vmem:[#allocation3] sm:$0xff] %vm399_vm2, %v1094_v2  ;;  %v1097_v10 = vmov 0   ;;  %vm482_vm3 = vcmask 1043456  }
  0x27   : > { %874 = vmatpush3.bf16.xpose.msra.mxu0 %v404_v1  ;;  %885 = vmatprep.subr.bf16.mxu1 %v1094_v2  ;;  %400 = vst.msk [vmem:[#allocation2] sm:$0xff] %vm399_vm2, %v1096_v9  ;;  %v405_v15 = vld [vmem:[%s381_s13] sm:$0xf]  ;;  %v984_v26 = vld [vmem:[%s1226_s23 + $0x8] sm:$0xff]   ;;  %v985_v27 = vld [vmem:[%s1226_s23 + $0x10] sm:$0xff]   ;;  %p649_p2 = scmp.eq.s32.totalorder %s1075_s21, 1 }
  0x28   : > { %879 = vmatprep.subr.bf16.mxu0 %v1094_v2  ;;  %901 = vmatprep.mubr.msk.bf16.mxu1 %vm1095_vm0, %v1094_v2  ;;  %v484_v16 = vsel %vm482_vm3, %v405_v15, 0  ;;  %v983_v25 = vld [vmem:[%s1226_s23] sm:$0xff]   ;;  %v986_v28 = vld [vmem:[%s1226_s23 + $0x18] sm:$0xff]   ;;  %v988_v30 = vld [vmem:[%s1226_s23 + $0x28] sm:$0xff]  }
  0x29   : > { %981 = vset.pattern.permute.xlu0 %v1097_v10  ;;  %982 = vset.pattern.permute.xlu1 %v1097_v10  ;;  %v987_v29 = vld [vmem:[%s1226_s23 + $0x20] sm:$0xff]   ;;  %v989_v31 = vld [vmem:[%s1226_s23 + $0x30] sm:$0xff]   ;;  %v990_v38 = vld [vmem:[%s1226_s23 + $0x38] sm:$0xff]  }
  0x2a   : > { %886 = vmatpush3.bf16.msra.mxu1 %v983_v25  ;;  %v542_v49 = vld [vmem:[#allocation5] sm:$0xff]  ;;  %v853_v56 = vld [vmem:[%s1328_s4] ss:$0 sm:$0xff] (%p649_p2) }
  0x2b   : > { %887 = vmatprep.subr.bf16.mxu1 %v1094_v2 }
  0x2d   : > { %v463_v32 = vld [vmem:[#allocation3] sm:$0xff] }
  0x2e   : > { %876 = vmatmul.mubr.bf16.vlgmr.msra.gmra.mrb[0].mxu0 %v403_v3  ;;  %v446_v11 = vld [vmem:[#allocation2] sm:$0xff]  ;;  %888 = vmatpush3.bf16.msra.mxu1 %v984_v26 }
  0x2f   : > { %881 = vmatprep.mubr.msk.bf16.mxu0 %vm1095_vm0, %v1094_v2  ;;  %880 = vmatpush3.bf16.msra.mxu0 %v484_v16 }
  0x30   : > { %889 = vmatprep.subr.bf16.mxu1 %v1094_v2 }
  0x32   : > { %890 = vmatpush3.bf16.msra.mxu1 %v985_v27 }
  0x33   : > { %891 = vmatprep.subr.bf16.mxu1 %v1094_v2 }
  0x36   : > { %892 = vmatpush3.bf16.msra.mxu1 %v986_v28 }
  0x37   : > { %893 = vmatprep.subr.bf16.mxu1 %v1094_v2 }
  0x3a   : > { %894 = vmatpush3.bf16.msra.mxu1 %v987_v29 }
  0x3b   : > { %895 = vmatprep.subr.bf16.mxu1 %v1094_v2 }
  0x3e   : > { %896 = vmatpush3.bf16.msra.mxu1 %v988_v30 }
  0x3f   : > { %897 = vmatprep.subr.bf16.mxu1 %v1094_v2 }
  0x42   : > { %898 = vmatpush3.bf16.msra.mxu1 %v989_v31 }
  0x43   : > { %899 = vmatprep.subr.bf16.mxu1 %v1094_v2 }
  0x46   : > { %900 = vmatpush3.bf16.msra.mxu1 %v990_v38 }
 0x101   : > { %v440_v4 = vpop.f32.mrb[0].mxu0 }
 0x102   : > { %v877_v5 = vpop.f32.mrb[1].mxu0  ;;  %v448_v6 = vsel %vm447_vm1, %v440_v4, -inf }
 0x103   : > { %449 = vmax.xlane.f32.xlu0 %v448_v6  ;;  %v443_v7 = vpop.f32.mrb[2].mxu0 }
 0x104   : > { %v878_v8 = vpop.f32.mrb[3].mxu0 }
 0x190   : > { %v450_v12 = vpop.xlane.xlu0 %449 }
 0x191   : > { %v451_v13 = vmax.f32 %v446_v11, %v450_v12 }
 0x193   : > { %v452_v14 = vsub.f32 %v446_v11, %v451_v13  ;;  %528 = vst.msk [vmem:[#allocation2] sm:$0xff] %vm399_vm2, %v451_v13  ;;  %457 = vperm.xlu0 %981, %v451_v13  }
 0x195   : > { %v453_v23 = vmul.f32 1.442695, %v452_v14 }
 0x212   : > { %v458_v17 = vpop.permute.xlu0 %457 }
 0x213   : > { %v460_v18 = vsub.f32 %v440_v4, %v458_v17 }
 0x215   : > { %v461_v19 = vmul.f32 1.442695, %v460_v18 }
 0x217   : > { %991 = vpow2.f32 %v461_v19 }
 0x218   : > { %993 = vpow2.f32 %v453_v23 }
 0x221   : > { %v992_v20 = vpop.eup %991 }
 0x222   : > { %v465_v21 = vsel %vm447_vm1, %v992_v20, 0.0  ;;  %v478_v22 = vpack.c.bf16 %v992_v20, %v992_v20  ;;  %v994_v24 = vpop.eup %993 }
 0x223   : > { %466 = vadd.xlane.f32.xlu1 %v465_v21  ;;  %v464_v33 = vmul.f32 %v994_v24, %v463_v32 }
 0x224   : > { %882 = vmatmul.mubr.msk.bf16.vlgmr.msra.gmra.mrb[4].mxu0 %vm447_vm1, %v478_v22 }
 0x234   : > { %474 = vperm.xlu1 %982, %v994_v24  }
 0x2b0   : > { %v467_v34 = vpop.xlane.xlu1 %466 }
 0x2b1   : > { %v468_v35 = vadd.f32 %v467_v34, %v464_v33 }
 0x2b3   : > { %470 = vst.msk [vmem:[#allocation3] sm:$0xff] %vm399_vm2, %v468_v35 }
 0x2b4   : > { %v475_v43 = vpop.permute.xlu1 %474 }
 0x2b5   : > { %v477_v44 = vmul.f32 0.0, %v475_v43 }
 0x2ba   : > { %v533_v36 = vld [vmem:[#allocation3] sm:$0xff] }
 0x2bb   : > { %995 = vrcp.f32 %v533_v36 }
 0x2c5   : > { %v996_v37 = vpop.eup %995 }
 0x2c6   : > { %537 = vperm.xlu1 %982, %v996_v37  }
 0x2f7   : > { %v520_v39 = vpop.f32.mrb[4].mxu0 }
 0x2f8   : > { %v883_v40 = vpop.f32.mrb[5].mxu0  ;;  %v526_v45 = vadd.f32 %v520_v39, %v477_v44 }
 0x2f9   : > { %v523_v41 = vpop.f32.mrb[6].mxu0 }
 0x2fa   : > { %v884_v42 = vpop.f32.mrb[7].mxu0 }
 0x345   : > { %v538_v46 = vpop.permute.xlu1 %537 }
 0x346   : > { %v540_v47 = vmul.f32 %v538_v46, %v526_v45 }
 0x348   : > { %v541_v48 = vpack.c.bf16 %v540_v47, %v540_v47 }
 0x34a   : > { %902 = vmatmul.mubr.bf16.vlgmr.msra.gmra.mrb[0].mxu1 %v541_v48 }
 0x41a   : > { %653 = sbr.rel (!%p649_p2) target bundleno = 1067 (0x42b), region = 56 }
 0x41d   : > { %v641_v50 = vpop.f32.mrb[0].mxu1 }
 0x41e   : > { %v647_v51 = vadd.f32 %v641_v50, %v542_v49  ;;  %v903_v52 = vpop.f32.mrb[1].mxu1 }
 0x41f   : > { %v644_v53 = vpop.f32.mrb[2].mxu1 }
 0x420   : > { %648 = vst [vmem:[#allocation5] sm:$0xff] %v647_v51  ;;  %v904_v54 = vpop.f32.mrb[3].mxu1 }
 0x427   : > { %v654_v55 = vld [vmem:[#allocation5] sm:$0xff] }
 0x428   : > { %v662_v57 = vadd.f32 %v853_v56, %v654_v55 }
 0x42a   : > { %663 = vst [vmem:[%s345_s9] sm:$0xff] %v662_v57 }
 0x42b PF: > { %s855_s21 = sshll.u32 %s1079_s22, 7  ;;  %s679_s26 = sshll.u32 %s345_s9, 4  ;;  %s680_s26 = int_to_ptr.vmem [resolvable:$true] %s679_s26 }
 0x42c   : > { %s1273_s17 = scalar_lea.hbm %s1329_s5, %s855_s21  ;;  %s1341_s27 = sand.u32 1, %s1067_s19  }
 0x42d   : > { %s665_s7 = scalar_lea.sflag [#allocation7], %s1341_s27  ;;  %s997_s8 = scalar_lea.vmem %s680_s26, 128 }
 0x42e   : > { %p998_p4 = scmp.ne.s32.totalorder %s680_s26, %s997_s8  ;;  %s1098_s13 = smov [#allocation6]  }
 0x42f   : > { %s1001_s14 = sshll.u32 %s1098_s13, 4  ;;  %s1002_s14 = int_to_ptr.vmem [resolvable:$false] %s1001_s14 }
 0x430   : > { %p999_p5 = pnand %p998_p4, %p1178_p3  ;;  %s1003_s15 = scalar_lea.vmem %s1002_s14, 256 }
 0x431   : > { %p1004_p7 = scmp.lt.s32.totalorder %s680_s26, %s1002_s14  ;;  %p1005_p8 = scmp.lt.s32.totalorder %s1003_s15, %s997_s8 }
 0x432   : > { %p1000_p6 = pneg %p999_p5 }
 0x433   : > { %p1006_p10 = por %p1005_p8, %p1004_p7 }
 0x435   : > { %p1007_p11 = pnand %p1006_p10, %p1000_p6 }
 0x437   : > { %1010 = shalt.err (!%p1007_p11)
}
 0x438   : > { %s1011_s22 = scalar_lea.hbm %s1273_s17, 128  ;;  %s1015_s16 = scalar_lea.hbm %s1329_s5, 256 }
 0x439   : > { %p1012_p12 = scmp.ne.s32.totalorder %s1273_s17, %s1011_s22  ;;  %p1016_p1 = scmp.lt.u32.totalorder %s1273_s17, %s1329_s5 }
 0x43a   : > { %p1017_p2 = scmp.lt.u32.totalorder %s1015_s16, %s1011_s22  ;;  %p1019_p5 = scmp.lt.u32.totalorder %s1011_s22, %s1273_s17 }
 0x43b   : > { %p1013_p13 = pnand %p1012_p12, %p1178_p3 }
 0x43c   : > { %p1018_p4 = por %p1017_p2, %p1016_p1 }
 0x43d   : > { %p1014_p0 = pneg %p1013_p13 }
 0x43e   : > { %p1020_p6 = por %p1019_p5, %p1018_p4 }
 0x440   : > { %p1021_p7 = pnand %p1020_p6, %p1014_p0 }
 0x442   : > { %1024 = shalt.err (!%p1021_p7)
}
 0x443   : > { %905 = dma.vmem_to_hbm [thread:$0]  (%p1178_p3), %s680_s26, 128, %s1273_s17, %s665_s7  }
 0x444 PF: > { %p911_p8 = scmp.ge.s32.totalorder %s1091_s25, 2  ;;  %s691_s23 = sand.u32 1, %s1063_s18  }
 0x445   : > { %s692_s29 = scalar_lea.sflag [#allocation7], %s691_s23 }
 0x446   : > { %p908_p10 = pnand %p911_p8, %p1188_p9 }
 0x448   : > { %1058 = dma.done.wait (!%p908_p10), %s692_s29, 128  }
 0x449   : > { %1060 = vsyncadd (!%p908_p10), %s692_s29, 4294967168  ;;  %s18_s25 = sadd.s32 1, %s1091_s25   ;;  %s1342_s21 = sld [smem:[#allocation13_spill]] }
 0x44a   : > { %p15_p11 = scmp.ge.s32.totalorder %s18_s25, 6   ;;  %s1343_s30 = sld [smem:[#allocation9_spill]] }
 0x44b   : > { %s1344_s22 = sld [smem:[#allocation10_spill]]  ;;  %s1345_s23 = sld [smem:[#allocation11_spill]] }
 0x44c   : > { %s1346_s24 = sld [smem:[#allocation12_spill]]  ;;  %s1347_s18 = smov %s1067_s19 }
 0x44d   : > { %s1348_s19 = smov %s1071_s20  ;;  %17 = sbr.rel (!%p15_p11) target bundleno = 5 (0x5), region = 100 }
 0x44f   : > { %s1349_s20 = smov %s1342_s21 }
 0x450   : > { %s1350_s21 = smov %s1343_s30 }
 0x454   :  { %697 = vsyncpa [#allocation7], 1 }
 0x455   :  { %699 = vsyncpa [#allocation7 + $0x1], 1 }

</bundles_post_ra>
